<compile_context>
chip_gen: v7x
topology: tpu7x:2x2x1
jax: 0.10.0
libtpu: 0.0.40
codegen_flags: <defaults>
</compile_context>

<pallas_src>
import math

import jax
import jax.numpy as jnp
from jax.experimental import pallas as pl
from jax.experimental.pallas import tpu as pltpu


# ----------------------------------------------------------------------------
# VMEM planning constants (safe across v5e / v6e / v7x).
# ----------------------------------------------------------------------------
_VMEM_LIMIT_BYTES = 48 * 1024 * 1024   # explicit scoped-VMEM limit
_VMEM_BUDGET_BYTES = 24 * 1024 * 1024  # target double-buffered working set (~50%)
_LANES = 128


# ----------------------------------------------------------------------------
# Buffer construction (mirrors PositionalEncoding.__init__)
# ----------------------------------------------------------------------------
def positional_encoding_table(max_len, d_model, dtype=jnp.float32):
    """Precomputed sin/cos table == the module's registered `pe` buffer."""
    position = jnp.arange(max_len, dtype=jnp.float32)[:, None]
    div_term = jnp.exp(
        jnp.arange(0, d_model, 2, dtype=jnp.float32) * (-math.log(10000.0) / d_model)
    )
    pe = jnp.zeros((max_len, d_model), jnp.float32)
    pe = pe.at[:, 0::2].set(jnp.sin(position * div_term))
    pe = pe.at[:, 1::2].set(jnp.cos(position * div_term))
    return pe.astype(dtype)


# ----------------------------------------------------------------------------
# Pallas kernel
# ----------------------------------------------------------------------------
def _add_pe_kernel(x_ref, pe_ref, o_ref):
    # x tile: (block_b, block_r, lanes); pe tile: (block_r, lanes) -> broadcast
    # over batch inside the kernel (free: VPU reuses the same pe vregs).
    # Cast pe to the activation dtype here, fused into the add (no wrapper-side op).
    o_ref[...] = (x_ref[...] + pe_ref[...].astype(x_ref.dtype)).astype(o_ref.dtype)


# ----------------------------------------------------------------------------
# Block planning
# ----------------------------------------------------------------------------
def _sublane(*dtypes):
    """Second-to-last-dim alignment satisfying every dtype in the block mix."""
    min_bytes = min(jnp.dtype(d).itemsize for d in dtypes)
    return max(8, 32 // min_bytes)


def _plan_blocks(B, rows, lanes, x_bytes, pe_bytes, sublane):
    """Pick (block_b, block_r) from the VMEM byte budget.

    Double-buffered working set = 2 * block_r * lanes * (2*block_b*x_bytes + pe_bytes).
    """
    def working(bb, br):
        return 2 * br * lanes * (2 * bb * x_bytes + pe_bytes)

    # Largest sublane-aligned row tile (single batch element) under the budget.
    per_row = 2 * lanes * (2 * x_bytes + pe_bytes)
    block_r = max(sublane, (_VMEM_BUDGET_BYTES // per_row) // sublane * sublane)
    if block_r < rows:
        return 1, block_r

    # Whole sequence fits in one row tile: fold the batch dim in too, so tiny
    # shapes collapse to (ideally) a single grid step.
    block_r = rows  # full-extent block: always legal, no alignment requirement
    block_b = B
    while block_b > 1 and working(block_b, block_r) > _VMEM_BUDGET_BYTES:
        block_b = (block_b + 1) // 2
    return block_b, block_r


# ----------------------------------------------------------------------------
# Forward
# ----------------------------------------------------------------------------
def positional_encoding_forward(x, pe, *, donate_x=False):
    """forward(x) = dropout(x + pe[:S]) with dropout = identity (eval mode).

    x : (B, S, D) batch-first activations.
    pe: (max_len, D) precomputed positional-encoding buffer (passed whole; not
        sliced/cast on the wrapper side).
    """
    # TODO(synk): training-mode dropout not implemented (eval semantics); it would
    # use pltpu.prng_seed / pltpu.prng_random_bits inside the kernel.
    B, S, D = x.shape
    max_len, d_model = pe.shape
    assert d_model == D and S <= max_len

    x_bytes = jnp.dtype(x.dtype).itemsize
    pe_bytes = jnp.dtype(pe.dtype).itemsize
    sublane = _sublane(x.dtype, pe.dtype)

    if (S * D) % _LANES == 0:
        # Lane-dense fast path: repack so all 128 lanes are used even for small D.
        rows = (S * D) // _LANES
        lanes = _LANES
        x_k = x.reshape(B, rows, lanes)
        if (max_len * D) % _LANES == 0:
            pe_k = pe.reshape((max_len * D) // _LANES, lanes)  # free reshape, no slice
        else:
            pe_k = pe[:S].reshape(rows, lanes)                 # rare fallback copy
    else:
        # Fallback: native (S, D) layout, last dim = full D.
        rows, lanes = S, D
        x_k = x
        pe_k = pe

    block_b, block_r = _plan_blocks(B, rows, lanes, x_bytes, pe_bytes, sublane)

    # Tiny-shape corner case: if block_r == rows but rows is not sublane-aligned,
    # make the pe block full-extent (slice is a few KiB, one-time) to satisfy the
    # (8, 128) block-shape rule for pe.
    sublane_pe = max(8, 32 // pe_bytes)
    if block_r % sublane_pe != 0 and block_r != pe_k.shape[0]:
        pe_k = pe_k[:rows]

    # Batch innermost: the pe tile's block index is unchanged across consecutive
    # grid steps, so Pallas does not re-DMA it for every batch element.
    grid = (pl.cdiv(rows, block_r), pl.cdiv(B, block_b))

    out = pl.pallas_call(
        _add_pe_kernel,
        out_shape=jax.ShapeDtypeStruct((B, rows, lanes), x.dtype),
        grid=grid,
        in_specs=[
            pl.BlockSpec((block_b, block_r, lanes), lambda r, b: (b, r, 0)),
            pl.BlockSpec((block_r, lanes), lambda r, b: (r, 0)),
        ],
        out_specs=pl.BlockSpec((block_b, block_r, lanes), lambda r, b: (b, r, 0)),
        compiler_params=pltpu.CompilerParams(
            dimension_semantics=("parallel", "parallel"),
            vmem_limit_bytes=_VMEM_LIMIT_BYTES),
        input_output_aliases={0: 0} if donate_x else {},
    )(x_k, pe_k)
    return out.reshape(B, S, D)


# ----------------------------------------------------------------------------
if __name__ == "__main__":
    MAX_LEN = 5000
    key = jax.random.PRNGKey(0)
    k1, k2, k3 = jax.random.split(key, 3)

    # Small config consistent with the module: batch=2, seq=8, d_model=32.
    # (Lane-dense fast path, collapses to a single grid step.)
    B, S, D = 2, 8, 32
    pe = positional_encoding_table(MAX_LEN, D)
    x = jax.random.normal(k1, (B, S, D), jnp.float32)
    out = jax.block_until_ready(positional_encoding_forward(x, pe))
    ref = x + pe[None, :S]
    assert out.shape == (B, S, D), out.shape
    assert bool(jnp.all(jnp.isfinite(out)))
    assert bool(jnp.allclose(out, ref, rtol=1e-6, atol=1e-6))

    # Larger config: lane-dense path with pe passed whole (no wrapper slice),
    # whole problem folded into one grid step (B folded into the block).
    B2, S2, D2 = 2, 1024, 128
    pe2 = positional_encoding_table(MAX_LEN, D2)
    x2 = jax.random.normal(k2, (B2, S2, D2), jnp.float32)
    out2 = jax.block_until_ready(positional_encoding_forward(x2, pe2))
    assert bool(jnp.allclose(out2, x2 + pe2[None, :S2], rtol=1e-6, atol=1e-6))

    # Odd shape exercising the non-flattenable fallback path (S*D % 128 != 0).
    B3, S3, D3 = 2, 10, 48
    pe3 = positional_encoding_table(MAX_LEN, D3)
    x3 = jax.random.normal(k3, (B3, S3, D3), jnp.float32)
    out3 = jax.block_until_ready(positional_encoding_forward(x3, pe3))
    assert bool(jnp.allclose(out3, x3 + pe3[None, :S3], rtol=1e-6, atol=1e-6))

    print("KERNEL_OK")
</pallas_src>

<mosaic_0001>
module attributes {stable_mosaic.version = 11 : i64} {
  func.func @_add_pe_kernel(%arg0: i32, %arg1: i32, %arg2: memref<2x2x128xf32, #tpu.memory_space<vmem>>, %arg3: memref<2x128xf32, #tpu.memory_space<vmem>>, %arg4: memref<2x2x128xf32, #tpu.memory_space<vmem>>) attributes {dimension_semantics = [#tpu.dimension_semantics<parallel>, #tpu.dimension_semantics<parallel>], iteration_bounds = array<i64: 1, 1>, scalar_prefetch = 0 : i64, scratch_operands = 0 : i64, tpu.core_type = #tpu.core_type<tc>, window_params = [{transform_indices = @transform_0, window_bounds = array<i64: 2, 2, 128>}, {transform_indices = @transform_1, window_bounds = array<i64: 2, 128>}, {transform_indices = @transform_2, window_bounds = array<i64: 2, 2, 128>}]} {
    %c0 = arith.constant 0 : index
    %c0_0 = arith.constant 0 : index
    %c0_1 = arith.constant 0 : index
    %0 = vector.load %arg2[%c0, %c0_0, %c0_1] : memref<2x2x128xf32, #tpu.memory_space<vmem>>, vector<2x2x128xf32>
    %c0_2 = arith.constant 0 : index
    %c0_3 = arith.constant 0 : index
    %1 = vector.load %arg3[%c0_2, %c0_3] : memref<2x128xf32, #tpu.memory_space<vmem>>, vector<2x128xf32>
    %2 = vector.shape_cast %1 : vector<2x128xf32> to vector<1x2x128xf32>
    %3 = vector.broadcast %2 : vector<1x2x128xf32> to vector<2x2x128xf32>
    %4 = arith.addf %0, %3 : vector<2x2x128xf32>
    %c0_4 = arith.constant 0 : index
    %c0_5 = arith.constant 0 : index
    %c0_6 = arith.constant 0 : index
    %5 = vector.load %arg4[%c0_4, %c0_5, %c0_6] : memref<2x2x128xf32, #tpu.memory_space<vmem>>, vector<2x2x128xf32>
    tpu.vector_store %arg4[%c0_4, %c0_5, %c0_6], %4 {strides = array<i32>} : memref<2x2x128xf32, #tpu.memory_space<vmem>>, vector<2x2x128xf32>,
    return
  }
  func.func @transform_0(%arg0: i32, %arg1: i32) -> (i32, i32, i32) {
    %c0_i32 = arith.constant 0 : i32
    %c0_i32_0 = arith.constant 0 : i32
    return %arg1, %arg0, %c0_i32 : i32, i32, i32
  }
  func.func @transform_1(%arg0: i32, %arg1: i32) -> (i32, i32) {
    %c0_i32 = arith.constant 0 : i32
    %c0_i32_0 = arith.constant 0 : i32
    return %arg0, %c0_i32 : i32, i32
  }
  func.func @transform_2(%arg0: i32, %arg1: i32) -> (i32, i32, i32) {
    %c0_i32 = arith.constant 0 : i32
    %c0_i32_0 = arith.constant 0 : i32
    return %arg1, %arg0, %c0_i32 : i32, i32, i32
  }
}

</mosaic_0001>

<bundles_post_ra>
// kernel: tpu_custom_call.1
= control target key start
LH: loop header
LB: loop body
LE: loop exit
PB: predicated region body
PF: predicated region fallthrough
CT: control target
= control target key end

     0   :  { %7 = vsyncpa [#allocation3], 0  ;;  %s154_s0 = inlined_call_operand.hbm [shape: f32[2,2,128], index: 0, kind: input, shape index: {}]   ;;  %s155_s1 = inlined_call_operand.vmem [shape: f32[2,128], index: 1, kind: input, shape index: {}]   ;;  %s156_s2 = inlined_call_operand.hbm [shape: f32[2,2,128], index: 2, kind: output, shape index: {}]  }
   0x1   :  { %8 = vsyncpa [#allocation4], 0  ;;  %s102_s9 = smov [#allocation2]   ;;  %s54_s13 = scalar_lea.hbm %s154_s0, 64 }
   0x2   :  { %s14_s10 = sshll.u32 %s102_s9, 4  ;;  %p55_p0 = scmp.ne.s32.totalorder %s154_s0, %s54_s13  ;;  %s15_s10 = int_to_ptr.vmem [resolvable:$true] %s14_s10 }
   0x3   :  { %p58_p1 = scmp.lt.u32.totalorder %s54_s13, %s154_s0 }
   0x5   :  { %p60_p2 = pnand %p58_p1, %p55_p0 }
   0x7   :  { %63 = shalt.err (!%p60_p2)
}
   0x8   :  { %s64_s18 = scalar_lea.vmem %s15_s10, 64  ;;  %p69_p4 = scmp.lt.s32.totalorder %s15_s10, %s15_s10 }
   0x9   :  { %p65_p3 = scmp.ne.s32.totalorder %s15_s10, %s64_s18  ;;  %p70_p5 = scmp.lt.s32.totalorder %s64_s18, %s64_s18 }
   0xb   :  { %p71_p6 = por %p70_p5, %p69_p4 }
   0xd   :  { %p72_p7 = pnand %p71_p6, %p65_p3 }
   0xf   :  { %75 = shalt.err (!%p72_p7)
}
  0x10   :  { %s103_s19 = smov 32   ;;  %s104_s20 = smov 2  }
  0x11   :  { %20 = dma.hbm_to_vmem [thread:$0]  %s154_s0, 64, %s15_s10, [#allocation3], %s103_s19, %s103_s19, %s104_s20  }
  0x12   :  { %98 = dma.done.wait [#allocation3], 64  }
  0x13   :  { %99 = vsyncadd [#allocation3], 4294967232  ;;  %s105_s23 = smov [#allocation5]   ;;  %v26_v0 = vld [vmem:[#allocation2] sm:$0x3] }
  0x14   :  { %s38_s24 = sshll.u32 %s105_s23, 4  ;;  %v28_v1 = vld [vmem:[%s155_s1] sm:$0x3]  ;;  %v27_v2 = vld [vmem:[#allocation2 + $0x2] sm:$0x3]  ;;  %s39_s24 = int_to_ptr.vmem [resolvable:$true] %s38_s24 }
  0x15   :  { %v29_v3 = vadd.f32 %v28_v1, %v26_v0  ;;  %v30_v4 = vadd.f32 %v28_v1, %v27_v2  ;;  %s76_s27 = scalar_lea.vmem %s39_s24, 64  ;;  %p81_p9 = scmp.lt.s32.totalorder %s39_s24, %s39_s24 }
  0x16   :  { %p77_p8 = scmp.ne.s32.totalorder %s39_s24, %s76_s27  ;;  %p82_p10 = scmp.lt.s32.totalorder %s76_s27, %s76_s27 }
  0x17   :  { %31 = vst [vmem:[#allocation5] sm:$0x3] %v29_v3  ;;  %32 = vst [vmem:[#allocation5 + $0x2] sm:$0x3] %v30_v4 }
  0x18   :  { %p83_p11 = por %p82_p10, %p81_p9 }
  0x1a   :  { %p84_p12 = pnand %p83_p11, %p77_p8 }
  0x1c   :  { %87 = shalt.err (!%p84_p12)
}
  0x1d   :  { %s88_s29 = scalar_lea.hbm %s156_s2, 64 }
  0x1e   :  { %p89_p13 = scmp.ne.s32.totalorder %s156_s2, %s88_s29  ;;  %p92_p0 = scmp.lt.u32.totalorder %s88_s29, %s156_s2 }
  0x20   :  { %p94_p1 = pnand %p92_p0, %p89_p13 }
  0x22   :  { %97 = shalt.err (!%p94_p1)
}
  0x23   :  { %44 = dma.vmem_to_hbm [thread:$0]  %s39_s24, 64, %s156_s2, [#allocation4], %s103_s19, %s103_s19, %s104_s20  }
  0x24   :  { %100 = dma.done.wait [#allocation4], 64  }
  0x25   :  { %101 = vsyncadd [#allocation4], 4294967232 }
  0x26   :  { %48 = vsyncpa [#allocation3], 1 }
  0x27   :  { %49 = vsyncpa [#allocation4], 1 }

</bundles_post_ra>
